<compile_context>
chip_gen: v7x
topology: tpu7x:2x2x1
jax: 0.10.0
libtpu: 0.0.40
codegen_flags: <defaults>
</compile_context>

<pallas_src>
import jax
import jax.numpy as jnp
import numpy as np
from jax.experimental import pallas as pl
from jax.experimental.pallas import tpu as pltpu


# ----------------------------------------------------------------------------
# VMEM budgeting helpers (generation-aware)
# ----------------------------------------------------------------------------

def _vmem_capacity_bytes():
    """Physical VMEM per TensorCore; conservative 64 MiB (v7x) fallback."""
    try:
        info = pltpu.get_tpu_info()
        cap = getattr(info, "vmem_capacity_bytes", None)
        if cap:
            return int(cap)
    except Exception:
        pass
    return 64 * 1024 * 1024


def _vmem_bytes_needed(Bt, L, Cin, Cout, K, comp_itemsize):
    """Per-step VMEM estimate: IO double-buffers, weights, ONE shared slab,
    live f32 intermediates (h, h2) and spill headroom."""
    f32 = 4
    C = max(Cin, Cout)
    slab = Bt * L * K * C * comp_itemsize                     # shared im2col slab
    io = 2 * Bt * L * Cin * f32 + 2 * Bt * L * Cout * f32     # double-buffered x / out
    weights = 2 * (K * Cin * Cout + K * Cout * Cout) * comp_itemsize
    vecs = 16 * Cout * f32                                    # biases / LN params / gates
    inter = 2 * Bt * L * Cout * f32                           # live f32 h, h2
    spill = Bt * L * C * f32                                  # compiler spill headroom
    return slab + io + weights + vecs + inter + spill


def _pick_block_batch(B, L, Cin, Cout, K, comp_itemsize, vmem_budget):
    """Largest divisor of B that fits the budget, keeping >= 2 grid steps when
    possible (v7x megacore + DMA pipelining) and preferring Bt*L % 256 == 0."""
    fitting = [bt for bt in range(1, B + 1)
               if B % bt == 0
               and _vmem_bytes_needed(bt, L, Cin, Cout, K, comp_itemsize) <= vmem_budget]
    if not fitting:
        return 1
    min_steps = 2 if B >= 2 else 1
    pool = [bt for bt in fitting if B // bt >= min_steps] or fitting
    best = max(pool)
    # Prefer an MXU-friendly M dimension if it costs at most 2x in block size.
    for bt in sorted(pool, reverse=True):
        if (bt * L) % 256 == 0 and 2 * bt >= best:
            return bt
    return best


# ----------------------------------------------------------------------------
# Kernel factory
# ----------------------------------------------------------------------------

def make_residual_block_call(B, L, Cin, Cout, K, dilation, *,
                             eps=1e-8, compute_dtype=jnp.bfloat16,
                             block_batch=None, io_buffering=None):
    """Builds the pallas_call for one ResidualBlock forward."""
    assert Cin == Cout, (
        f"ResidualBlock residual add requires in_channel == out_channel "
        f"(got Cin={Cin}, Cout={Cout})")
    D1 = dilation
    D2 = 2 * dilation
    cdt = jnp.dtype(compute_dtype)
    KC = K * Cin                       # == K * Cout

    capacity = _vmem_capacity_bytes()
    budget = int(capacity * 0.55)
    Bt = block_batch or _pick_block_batch(B, L, Cin, Cout, K, cdt.itemsize, budget)
    assert B % Bt == 0, f"block_batch {Bt} must divide B={B}"

    def kernel(x_ref, w1_ref, b1_ref, g1_ref, bb1_ref,
               w2_ref, b2_ref, g2_ref, bb2_ref, gc1_ref, gc2_ref,
               out_ref, slab_ref):

        def build_slab(src, dil):
            # src: (Bt, L, C) in compute dtype.  One shifted store per tap
            # across ALL batch rows + one small causal zero wedge (K stores
            # per conv instead of Bt*K).  All slices are static.
            C = src.shape[-1]
            for k in range(K):
                shift = (K - 1 - k) * dil
                col0 = k * C
                if shift >= L:
                    slab_ref[:, :, col0:col0 + C] = jnp.zeros((Bt, L, C), cdt)
                    continue
                if shift > 0:
                    slab_ref[:, :shift, col0:col0 + C] = jnp.zeros((Bt, shift, C), cdt)
                slab_ref[:, shift:, col0:col0 + C] = src[:, :L - shift, :]

        # ---- conv1: im2col slab + ONE fused MXU matmul (f32 accumulate) ----
        # Don't keep the f32 x live across the body; re-read it for the
        # residual add at the end (the input block stays VMEM-resident).
        build_slab(x_ref[...].astype(cdt), D1)
        h = jnp.dot(slab_ref[...].reshape(Bt * L, KC), w1_ref[...],
                    preferred_element_type=jnp.float32)       # (Bt*L, Cout)
        h = h + b1_ref[...]                                   # row-broadcast bias

        # LayerNorm (eps=1e-8) + ReLU + sigmoid task gate — f32 epilogue
        # (v5e has no bf16 VPU/EUP path).
        mu = jnp.mean(h, axis=-1, keepdims=True)
        var = jnp.mean((h - mu) ** 2, axis=-1, keepdims=True)
        h = (h - mu) * jax.lax.rsqrt(var + eps)
        h = jnp.maximum(h * g1_ref[...] + bb1_ref[...], 0.0) * gc1_ref[...]

        # ---- conv2 (dilation * 2): reuse the SAME slab scratch ----
        build_slab(h.reshape(Bt, L, Cout).astype(cdt), D2)
        h2 = jnp.dot(slab_ref[...].reshape(Bt * L, KC), w2_ref[...],
                     preferred_element_type=jnp.float32)
        h2 = h2 + b2_ref[...]

        mu = jnp.mean(h2, axis=-1, keepdims=True)
        var = jnp.mean((h2 - mu) ** 2, axis=-1, keepdims=True)
        h2 = (h2 - mu) * jax.lax.rsqrt(var + eps)
        h2 = jnp.maximum(h2 * g2_ref[...] + bb2_ref[...], 0.0) * gc2_ref[...]

        # Residual add: re-read the VMEM-resident input block.
        out_ref[...] = (h2.reshape(Bt, L, Cout) + x_ref[...]).astype(out_ref.dtype)

    io_kwargs = {}
    if io_buffering is not None and int(io_buffering) >= 2:
        # Deeper pipelining for x/out when the per-step DMA is exposed
        # (v5e/v6e with VMEM headroom only).
        io_kwargs = dict(pipeline_mode=pl.Buffered(int(io_buffering)))

    vec = pl.BlockSpec((1, Cout), lambda i: (0, 0))
    grid_spec = pltpu.PrefetchScalarGridSpec(
        num_scalar_prefetch=0,
        grid=(B // Bt,),
        in_specs=[
            pl.BlockSpec((Bt, L, Cin), lambda i: (i, 0, 0), **io_kwargs),   # x
            pl.BlockSpec((K * Cin, Cout), lambda i: (0, 0)),                # conv1 w (flat)
            vec, vec, vec,                                                  # conv1 b, ln1 g/b
            pl.BlockSpec((K * Cout, Cout), lambda i: (0, 0)),               # conv2 w (flat)
            vec, vec, vec,                                                  # conv2 b, ln2 g/b
            vec, vec,                                                       # gc1, gc2
        ],
        out_specs=pl.BlockSpec((Bt, L, Cout), lambda i: (i, 0, 0), **io_kwargs),
        scratch_shapes=[
            pltpu.VMEM((Bt, L, KC), cdt),       # ONE shared im2col slab (both convs)
        ],
    )

    needed = _vmem_bytes_needed(Bt, L, Cin, Cout, K, cdt.itemsize)
    # Raise the scoped VMEM limit when blocks get big, but never above physical
    # VMEM minus headroom (v7x: 64 MiB/TC -> cap ~56 MiB; v5e/v6e: 128 MiB).
    hard_cap = capacity - 8 * 1024 * 1024
    vmem_limit = int(min(max(int(1.25 * needed), 32 * 1024 * 1024), hard_cap))

    # TODO(synk): very long L should be L-tiled with a causal halo carried in
    # scratch instead of one full-L block (matters on v7x's 64 MiB VMEM).
    # TODO(synk): if production channel count is small (like the C=8 demo), the
    # matmul/LN/store path is lane-starved (Cout<128); pad channels in the
    # surrounding model (LN must then mask padded channels) or use K
    # shift-and-MAC VPU ops instead of the MXU.
    # TODO(synk): on v5e with small C, per-tap accumulating matmuls (no im2col
    # slab) cut the vst traffic by ~K x; not implemented here.

    return pl.pallas_call(
        kernel,
        out_shape=jax.ShapeDtypeStruct((B, L, Cout), jnp.float32),
        grid_spec=grid_spec,
        compiler_params=pltpu.CompilerParams(
            dimension_semantics=("parallel",),   # batch steps are independent
            vmem_limit_bytes=vmem_limit),
    )


# ----------------------------------------------------------------------------
# Module-level wrapper (mirrors ResidualBlock.forward)
# ----------------------------------------------------------------------------

def residual_block_forward(x_list, params, *, kernel_size, dilation,
                           compute_dtype=jnp.bfloat16, block_batch=None,
                           io_buffering=None):
    """x_list = [x, s, masks_list, t_, dev] (same positional contract as torch)."""
    x, s, masks_list, t_, dev = x_list
    # TODO(synk): x_[4] (torch device) and in-place masks_list mutation are
    # host-side glue with no kernel equivalent; passed through unchanged.
    (w1, b1, g1, bb1, w2, b2, g2, bb2, ec1_w, ec2_w) = params
    B, L, Cin = x.shape
    K = kernel_size
    Cout = w1.shape[-1]

    # Task gates are tiny (1, Cout); computed outside the kernel so no two
    # (possibly parallel) grid steps touch shared state.
    gc1 = jax.nn.sigmoid(jnp.float32(s) * ec1_w[t_]).reshape(1, Cout).astype(jnp.float32)
    gc2 = jax.nn.sigmoid(jnp.float32(s) * ec2_w[t_]).reshape(1, Cout).astype(jnp.float32)

    # Flatten conv weights once to match the im2col slab column layout.
    w1f = w1.reshape(K * Cin, Cout).astype(compute_dtype)
    w2f = w2.reshape(K * Cout, Cout).astype(compute_dtype)

    call = make_residual_block_call(B, L, Cin, Cout, K, dilation,
                                    compute_dtype=compute_dtype,
                                    block_batch=block_batch,
                                    io_buffering=io_buffering)
    out = call(x, w1f, b1, g1, bb1, w2f, b2, g2, bb2, gc1, gc2)
    masks_list = masks_list + [gc1, gc2]
    return [out, s, masks_list, t_, dev]


# ----------------------------------------------------------------------------
# Pure-JAX reference (same semantics as the PyTorch forward)
# ----------------------------------------------------------------------------

def reference_forward(x, s, t_, params, *, K, dilation, eps=1e-8):
    (w1, b1, g1, bb1, w2, b2, g2, bb2, ec1_w, ec2_w) = params
    gc1 = jax.nn.sigmoid(s * ec1_w[t_])
    gc2 = jax.nn.sigmoid(s * ec2_w[t_])

    def causal_conv(inp, w, b, dil):
        out = jax.lax.conv_general_dilated(
            inp, w, window_strides=(1,),
            padding=[((K - 1) * dil, 0)],
            rhs_dilation=(dil,),
            dimension_numbers=('NWC', 'WIO', 'NWC'))
        return out + b

    def ln(h, g, bb):
        mu = h.mean(-1, keepdims=True)
        var = ((h - mu) ** 2).mean(-1, keepdims=True)
        return (h - mu) / jnp.sqrt(var + eps) * g + bb

    h = causal_conv(x, w1, b1, dilation)
    h = jax.nn.relu(ln(h, g1, bb1)) * gc1
    h = causal_conv(h, w2, b2, 2 * dilation)
    h = jax.nn.relu(ln(h, g2, bb2)) * gc2
    return h + x, gc1, gc2


if __name__ == "__main__":
    B, L, C = 4, 16, 8          # in_channel == out_channel so residual add is valid
    K, dilation = 3, 1
    s = 3.5                     # annealing scalar (x_[1] in the module)
    t_ = 2                      # task index (x_[3] in the module)

    key = jax.random.PRNGKey(0)
    ks = jax.random.split(key, 8)
    x = jax.random.normal(ks[0], (B, L, C), jnp.float32)

    # deterministic synthetic parameters (shapes per module __init__)
    w1 = jax.random.normal(ks[1], (K, C, C), jnp.float32) * 0.2  # weight[co,ci,0,k] -> [k,ci,co]
    b1 = jax.random.normal(ks[2], (1, C), jnp.float32) * 0.1
    w2 = jax.random.normal(ks[3], (K, C, C), jnp.float32) * 0.2
    b2 = jax.random.normal(ks[4], (1, C), jnp.float32) * 0.1
    g1, bb1 = jnp.ones((1, C), jnp.float32), jnp.zeros((1, C), jnp.float32)  # LN defaults
    g2, bb2 = jnp.ones((1, C), jnp.float32), jnp.zeros((1, C), jnp.float32)
    ec1_w = jax.random.uniform(ks[5], (6, C), jnp.float32, 0.0, 2.0)         # task_embs=[0,2]
    ec2_w = jax.random.uniform(ks[6], (6, C), jnp.float32, 0.0, 2.0)
    params = (w1, b1, g1, bb1, w2, b2, g2, bb2, ec1_w, ec2_w)

    out_ref, gc1_ref, gc2_ref = reference_forward(x, s, t_, params, K=K, dilation=dilation)

    # --- f32 MXU operands (tight check) ---
    res = residual_block_forward([x, s, [], t_, None], params,
                                 kernel_size=K, dilation=dilation,
                                 compute_dtype=jnp.float32)
    out, _, masks_list, _, _ = res
    gc1, gc2 = masks_list
    jax.block_until_ready((out, gc1, gc2))
    np.testing.assert_allclose(np.asarray(out), np.asarray(out_ref), rtol=1e-4, atol=1e-4)
    np.testing.assert_allclose(np.asarray(gc1)[0], np.asarray(gc1_ref), rtol=1e-5, atol=1e-5)
    np.testing.assert_allclose(np.asarray(gc2)[0], np.asarray(gc2_ref), rtol=1e-5, atol=1e-5)

    # --- default bf16 MXU operands (native MXU rate), f32 accumulate + f32 epilogue ---
    res_bf16 = residual_block_forward([x, s, [], t_, None], params,
                                      kernel_size=K, dilation=dilation)
    out_bf16 = jax.block_until_ready(res_bf16[0])
    np.testing.assert_allclose(np.asarray(out_bf16), np.asarray(out_ref),
                               rtol=5e-2, atol=5e-2)

    print("KERNEL_OK")
</pallas_src>

<mosaic_0001>
module attributes {stable_mosaic.version = 11 : i64} {
  func.func @kernel(%arg0: i32, %arg1: memref<2x16x8xf32, #tpu.memory_space<vmem>>, %arg2: memref<24x8xf32, #tpu.memory_space<vmem>>, %arg3: memref<1x8xf32, #tpu.memory_space<vmem>>, %arg4: memref<1x8xf32, #tpu.memory_space<vmem>>, %arg5: memref<1x8xf32, #tpu.memory_space<vmem>>, %arg6: memref<24x8xf32, #tpu.memory_space<vmem>>, %arg7: memref<1x8xf32, #tpu.memory_space<vmem>>, %arg8: memref<1x8xf32, #tpu.memory_space<vmem>>, %arg9: memref<1x8xf32, #tpu.memory_space<vmem>>, %arg10: memref<1x8xf32, #tpu.memory_space<vmem>>, %arg11: memref<1x8xf32, #tpu.memory_space<vmem>>, %arg12: memref<2x16x8xf32, #tpu.memory_space<vmem>>, %arg13: memref<2x16x24xf32, #tpu.memory_space<vmem>>) attributes {dimension_semantics = [#tpu.dimension_semantics<parallel>], iteration_bounds = array<i64: 2>, scalar_prefetch = 0 : i64, scratch_operands = 1 : i64, tpu.core_type = #tpu.core_type<tc>, window_params = [{transform_indices = @transform_0, window_bounds = array<i64: 2, 16, 8>}, {pipeline_mode = #tpu.pipeline_mode<synchronous>, transform_indices = @transform_1, window_bounds = array<i64: 24, 8>}, {pipeline_mode = #tpu.pipeline_mode<synchronous>, transform_indices = @transform_2, window_bounds = array<i64: 1, 8>}, {pipeline_mode = #tpu.pipeline_mode<synchronous>, transform_indices = @transform_3, window_bounds = array<i64: 1, 8>}, {pipeline_mode = #tpu.pipeline_mode<synchronous>, transform_indices = @transform_4, window_bounds = array<i64: 1, 8>}, {pipeline_mode = #tpu.pipeline_mode<synchronous>, transform_indices = @transform_5, window_bounds = array<i64: 24, 8>}, {pipeline_mode = #tpu.pipeline_mode<synchronous>, transform_indices = @transform_6, window_bounds = array<i64: 1, 8>}, {pipeline_mode = #tpu.pipeline_mode<synchronous>, transform_indices = @transform_7, window_bounds = array<i64: 1, 8>}, {pipeline_mode = #tpu.pipeline_mode<synchronous>, transform_indices = @transform_8, window_bounds = array<i64: 1, 8>}, {pipeline_mode = #tpu.pipeline_mode<synchronous>, transform_indices = @transform_9, window_bounds = array<i64: 1, 8>}, {pipeline_mode = #tpu.pipeline_mode<synchronous>, transform_indices = @transform_10, window_bounds = array<i64: 1, 8>}, {transform_indices = @transform_11, window_bounds = array<i64: 2, 16, 8>}]} {
    %c0 = arith.constant 0 : index
    %c0_0 = arith.constant 0 : index
    %c0_1 = arith.constant 0 : index
    %0 = vector.load %arg1[%c0, %c0_0, %c0_1] : memref<2x16x8xf32, #tpu.memory_space<vmem>>, vector<2x16x8xf32>
    %cst = arith.constant 0.000000e+00 : f32
    %1 = vector.broadcast %cst : f32 to vector<2x2x8xf32>
    %c0_2 = arith.constant 0 : index
    %c0_3 = arith.constant 0 : index
    %c0_4 = arith.constant 0 : index
    %2 = vector.load %arg13[%c0_2, %c0_3, %c0_4] : memref<2x16x24xf32, #tpu.memory_space<vmem>>, vector<2x2x8xf32>
    tpu.vector_store %arg13[%c0_2, %c0_3, %c0_4], %1 {strides = array<i32>} : memref<2x16x24xf32, #tpu.memory_space<vmem>>, vector<2x2x8xf32>,
    %3 = vector.extract_strided_slice %0 {offsets = [0, 0, 0], sizes = [2, 14, 8], strides = [1, 1, 1]} : vector<2x16x8xf32> to vector<2x14x8xf32>
    %c0_5 = arith.constant 0 : index
    %c2 = arith.constant 2 : index
    %c0_6 = arith.constant 0 : index
    %4 = vector.load %arg13[%c0_5, %c2, %c0_6] : memref<2x16x24xf32, #tpu.memory_space<vmem>>, vector<2x14x8xf32>
    tpu.vector_store %arg13[%c0_5, %c2, %c0_6], %3 {strides = array<i32>} : memref<2x16x24xf32, #tpu.memory_space<vmem>>, vector<2x14x8xf32>,
    %cst_7 = arith.constant 0.000000e+00 : f32
    %5 = vector.broadcast %cst_7 : f32 to vector<2x1x8xf32>
    %c0_8 = arith.constant 0 : index
    %c0_9 = arith.constant 0 : index
    %c8 = arith.constant 8 : index
    %6 = vector.load %arg13[%c0_8, %c0_9, %c8] : memref<2x16x24xf32, #tpu.memory_space<vmem>>, vector<2x1x8xf32>
    tpu.vector_store %arg13[%c0_8, %c0_9, %c8], %5 {strides = array<i32>} : memref<2x16x24xf32, #tpu.memory_space<vmem>>, vector<2x1x8xf32>,
    %7 = vector.extract_strided_slice %0 {offsets = [0, 0, 0], sizes = [2, 15, 8], strides = [1, 1, 1]} : vector<2x16x8xf32> to vector<2x15x8xf32>
    %c0_10 = arith.constant 0 : index
    %c1 = arith.constant 1 : index
    %c8_11 = arith.constant 8 : index
    %8 = vector.load %arg13[%c0_10, %c1, %c8_11] : memref<2x16x24xf32, #tpu.memory_space<vmem>>, vector<2x15x8xf32>
    tpu.vector_store %arg13[%c0_10, %c1, %c8_11], %7 {strides = array<i32>} : memref<2x16x24xf32, #tpu.memory_space<vmem>>, vector<2x15x8xf32>,
    %c0_12 = arith.constant 0 : index
    %c0_13 = arith.constant 0 : index
    %c16 = arith.constant 16 : index
    %9 = vector.load %arg13[%c0_12, %c0_13, %c16] : memref<2x16x24xf32, #tpu.memory_space<vmem>>, vector<2x16x8xf32>
    tpu.vector_store %arg13[%c0_12, %c0_13, %c16], %0 {strides = array<i32>} : memref<2x16x24xf32, #tpu.memory_space<vmem>>, vector<2x16x8xf32>,
    %c0_14 = arith.constant 0 : index
    %c0_15 = arith.constant 0 : index
    %c0_16 = arith.constant 0 : index
    %10 = vector.load %arg13[%c0_14, %c0_15, %c0_16] : memref<2x16x24xf32, #tpu.memory_space<vmem>>, vector<2x16x24xf32>
    %11 = vector.shape_cast %10 : vector<2x16x24xf32> to vector<32x24xf32>
    %c0_17 = arith.constant 0 : index
    %c0_18 = arith.constant 0 : index
    %12 = vector.load %arg2[%c0_17, %c0_18] : memref<24x8xf32, #tpu.memory_space<vmem>>, vector<24x8xf32>
    %cst_19 = arith.constant dense<0.000000e+00> : vector<32x8xf32>
    %13 = tpu.matmul %11, %12, %cst_19 {dimension_numbers = #tpu.dot_dimension_numbers<[1], [0], [0], [1], [0, 0, 1, 1], [], []>} : vector<32x24xf32>, vector<24x8xf32>, vector<32x8xf32> -> vector<32x8xf32>
    %c0_20 = arith.constant 0 : index
    %c0_21 = arith.constant 0 : index
    %14 = vector.load %arg3[%c0_20, %c0_21] : memref<1x8xf32, #tpu.memory_space<vmem>>, vector<1x8xf32>
    %15 = vector.broadcast %14 : vector<1x8xf32> to vector<32x8xf32>
    %16 = arith.addf %13, %15 : vector<32x8xf32>
    %cst_22 = arith.constant dense<0.000000e+00> : vector<32xf32>
    %17 = vector.multi_reduction <add>, %16, %cst_22 [1] : vector<32x8xf32> to vector<32xf32>
    %18 = vector.shape_cast %17 : vector<32xf32> to vector<32x1xf32>
    %cst_23 = arith.constant 8.000000e+00 : f32
    %19 = vector.broadcast %cst_23 : f32 to vector<32x1xf32>
    %20 = arith.divf %18, %19 : vector<32x1xf32>
    %21 = vector.broadcast %20 : vector<32x1xf32> to vector<32x8xf32>
    %22 = arith.subf %16, %21 : vector<32x8xf32>
    %23 = arith.mulf %22, %22 : vector<32x8xf32>
    %cst_24 = arith.constant dense<0.000000e+00> : vector<32xf32>
    %24 = vector.multi_reduction <add>, %23, %cst_24 [1] : vector<32x8xf32> to vector<32xf32>
    %25 = vector.shape_cast %24 : vector<32xf32> to vector<32x1xf32>
    %cst_25 = arith.constant 8.000000e+00 : f32
    %26 = vector.broadcast %cst_25 : f32 to vector<32x1xf32>
    %27 = arith.divf %25, %26 : vector<32x1xf32>
    %28 = vector.broadcast %20 : vector<32x1xf32> to vector<32x8xf32>
    %29 = arith.subf %16, %28 : vector<32x8xf32>
    %cst_26 = arith.constant 9.99999993E-9 : f32
    %30 = vector.broadcast %cst_26 : f32 to vector<32x1xf32>
    %31 = arith.addf %27, %30 : vector<32x1xf32>
    %32 = math.rsqrt %31 : vector<32x1xf32>
    %33 = vector.broadcast %32 : vector<32x1xf32> to vector<32x8xf32>
    %34 = arith.mulf %29, %33 : vector<32x8xf32>
    %c0_27 = arith.constant 0 : index
    %c0_28 = arith.constant 0 : index
    %35 = vector.load %arg4[%c0_27, %c0_28] : memref<1x8xf32, #tpu.memory_space<vmem>>, vector<1x8xf32>
    %36 = vector.broadcast %35 : vector<1x8xf32> to vector<32x8xf32>
    %37 = arith.mulf %34, %36 : vector<32x8xf32>
    %c0_29 = arith.constant 0 : index
    %c0_30 = arith.constant 0 : index
    %38 = vector.load %arg5[%c0_29, %c0_30] : memref<1x8xf32, #tpu.memory_space<vmem>>, vector<1x8xf32>
    %39 = vector.broadcast %38 : vector<1x8xf32> to vector<32x8xf32>
    %40 = arith.addf %37, %39 : vector<32x8xf32>
    %cst_31 = arith.constant 0.000000e+00 : f32
    %41 = vector.broadcast %cst_31 : f32 to vector<32x8xf32>
    %42 = arith.maximumf %40, %41 : vector<32x8xf32>
    %c0_32 = arith.constant 0 : index
    %c0_33 = arith.constant 0 : index
    %43 = vector.load %arg10[%c0_32, %c0_33] : memref<1x8xf32, #tpu.memory_space<vmem>>, vector<1x8xf32>
    %44 = vector.broadcast %43 : vector<1x8xf32> to vector<32x8xf32>
    %45 = arith.mulf %42, %44 : vector<32x8xf32>
    %46 = vector.shape_cast %45 : vector<32x8xf32> to vector<2x16x8xf32>
    %cst_34 = arith.constant 0.000000e+00 : f32
    %47 = vector.broadcast %cst_34 : f32 to vector<2x4x8xf32>
    %c0_35 = arith.constant 0 : index
    %c0_36 = arith.constant 0 : index
    %c0_37 = arith.constant 0 : index
    %48 = vector.load %arg13[%c0_35, %c0_36, %c0_37] : memref<2x16x24xf32, #tpu.memory_space<vmem>>, vector<2x4x8xf32>
    tpu.vector_store %arg13[%c0_35, %c0_36, %c0_37], %47 {strides = array<i32>} : memref<2x16x24xf32, #tpu.memory_space<vmem>>, vector<2x4x8xf32>,
    %49 = vector.extract_strided_slice %46 {offsets = [0, 0, 0], sizes = [2, 12, 8], strides = [1, 1, 1]} : vector<2x16x8xf32> to vector<2x12x8xf32>
    %c0_38 = arith.constant 0 : index
    %c4 = arith.constant 4 : index
    %c0_39 = arith.constant 0 : index
    %50 = vector.load %arg13[%c0_38, %c4, %c0_39] : memref<2x16x24xf32, #tpu.memory_space<vmem>>, vector<2x12x8xf32>
    tpu.vector_store %arg13[%c0_38, %c4, %c0_39], %49 {strides = array<i32>} : memref<2x16x24xf32, #tpu.memory_space<vmem>>, vector<2x12x8xf32>,
    %cst_40 = arith.constant 0.000000e+00 : f32
    %51 = vector.broadcast %cst_40 : f32 to vector<2x2x8xf32>
    %c0_41 = arith.constant 0 : index
    %c0_42 = arith.constant 0 : index
    %c8_43 = arith.constant 8 : index
    %52 = vector.load %arg13[%c0_41, %c0_42, %c8_43] : memref<2x16x24xf32, #tpu.memory_space<vmem>>, vector<2x2x8xf32>
    tpu.vector_store %arg13[%c0_41, %c0_42, %c8_43], %51 {strides = array<i32>} : memref<2x16x24xf32, #tpu.memory_space<vmem>>, vector<2x2x8xf32>,
    %53 = vector.extract_strided_slice %46 {offsets = [0, 0, 0], sizes = [2, 14, 8], strides = [1, 1, 1]} : vector<2x16x8xf32> to vector<2x14x8xf32>
    %c0_44 = arith.constant 0 : index
    %c2_45 = arith.constant 2 : index
    %c8_46 = arith.constant 8 : index
    %54 = vector.load %arg13[%c0_44, %c2_45, %c8_46] : memref<2x16x24xf32, #tpu.memory_space<vmem>>, vector<2x14x8xf32>
    tpu.vector_store %arg13[%c0_44, %c2_45, %c8_46], %53 {strides = array<i32>} : memref<2x16x24xf32, #tpu.memory_space<vmem>>, vector<2x14x8xf32>,
    %c0_47 = arith.constant 0 : index
    %c0_48 = arith.constant 0 : index
    %c16_49 = arith.constant 16 : index
    %55 = vector.load %arg13[%c0_47, %c0_48, %c16_49] : memref<2x16x24xf32, #tpu.memory_space<vmem>>, vector<2x16x8xf32>
    tpu.vector_store %arg13[%c0_47, %c0_48, %c16_49], %46 {strides = array<i32>} : memref<2x16x24xf32, #tpu.memory_space<vmem>>, vector<2x16x8xf32>,
    %c0_50 = arith.constant 0 : index
    %c0_51 = arith.constant 0 : index
    %c0_52 = arith.constant 0 : index
    %56 = vector.load %arg13[%c0_50, %c0_51, %c0_52] : memref<2x16x24xf32, #tpu.memory_space<vmem>>, vector<2x16x24xf32>
    %57 = vector.shape_cast %56 : vector<2x16x24xf32> to vector<32x24xf32>
    %c0_53 = arith.constant 0 : index
    %c0_54 = arith.constant 0 : index
    %58 = vector.load %arg6[%c0_53, %c0_54] : memref<24x8xf32, #tpu.memory_space<vmem>>, vector<24x8xf32>
    %cst_55 = arith.constant dense<0.000000e+00> : vector<32x8xf32>
    %59 = tpu.matmul %57, %58, %cst_55 {dimension_numbers = #tpu.dot_dimension_numbers<[1], [0], [0], [1], [0, 0, 1, 1], [], []>} : vector<32x24xf32>, vector<24x8xf32>, vector<32x8xf32> -> vector<32x8xf32>
    %c0_56 = arith.constant 0 : index
    %c0_57 = arith.constant 0 : index
    %60 = vector.load %arg7[%c0_56, %c0_57] : memref<1x8xf32, #tpu.memory_space<vmem>>, vector<1x8xf32>
    %61 = vector.broadcast %60 : vector<1x8xf32> to vector<32x8xf32>
    %62 = arith.addf %59, %61 : vector<32x8xf32>
    %cst_58 = arith.constant dense<0.000000e+00> : vector<32xf32>
    %63 = vector.multi_reduction <add>, %62, %cst_58 [1] : vector<32x8xf32> to vector<32xf32>
    %64 = vector.shape_cast %63 : vector<32xf32> to vector<32x1xf32>
    %cst_59 = arith.constant 8.000000e+00 : f32
    %65 = vector.broadcast %cst_59 : f32 to vector<32x1xf32>
    %66 = arith.divf %64, %65 : vector<32x1xf32>
    %67 = vector.broadcast %66 : vector<32x1xf32> to vector<32x8xf32>
    %68 = arith.subf %62, %67 : vector<32x8xf32>
    %69 = arith.mulf %68, %68 : vector<32x8xf32>
    %cst_60 = arith.constant dense<0.000000e+00> : vector<32xf32>
    %70 = vector.multi_reduction <add>, %69, %cst_60 [1] : vector<32x8xf32> to vector<32xf32>
    %71 = vector.shape_cast %70 : vector<32xf32> to vector<32x1xf32>
    %cst_61 = arith.constant 8.000000e+00 : f32
    %72 = vector.broadcast %cst_61 : f32 to vector<32x1xf32>
    %73 = arith.divf %71, %72 : vector<32x1xf32>
    %74 = vector.broadcast %66 : vector<32x1xf32> to vector<32x8xf32>
    %75 = arith.subf %62, %74 : vector<32x8xf32>
    %cst_62 = arith.constant 9.99999993E-9 : f32
    %76 = vector.broadcast %cst_62 : f32 to vector<32x1xf32>
    %77 = arith.addf %73, %76 : vector<32x1xf32>
    %78 = math.rsqrt %77 : vector<32x1xf32>
    %79 = vector.broadcast %78 : vector<32x1xf32> to vector<32x8xf32>
    %80 = arith.mulf %75, %79 : vector<32x8xf32>
    %c0_63 = arith.constant 0 : index
    %c0_64 = arith.constant 0 : index
    %81 = vector.load %arg8[%c0_63, %c0_64] : memref<1x8xf32, #tpu.memory_space<vmem>>, vector<1x8xf32>
    %82 = vector.broadcast %81 : vector<1x8xf32> to vector<32x8xf32>
    %83 = arith.mulf %80, %82 : vector<32x8xf32>
    %c0_65 = arith.constant 0 : index
    %c0_66 = arith.constant 0 : index
    %84 = vector.load %arg9[%c0_65, %c0_66] : memref<1x8xf32, #tpu.memory_space<vmem>>, vector<1x8xf32>
    %85 = vector.broadcast %84 : vector<1x8xf32> to vector<32x8xf32>
    %86 = arith.addf %83, %85 : vector<32x8xf32>
    %cst_67 = arith.constant 0.000000e+00 : f32
    %87 = vector.broadcast %cst_67 : f32 to vector<32x8xf32>
    %88 = arith.maximumf %86, %87 : vector<32x8xf32>
    %c0_68 = arith.constant 0 : index
    %c0_69 = arith.constant 0 : index
    %89 = vector.load %arg11[%c0_68, %c0_69] : memref<1x8xf32, #tpu.memory_space<vmem>>, vector<1x8xf32>
    %90 = vector.broadcast %89 : vector<1x8xf32> to vector<32x8xf32>
    %91 = arith.mulf %88, %90 : vector<32x8xf32>
    %92 = vector.shape_cast %91 : vector<32x8xf32> to vector<2x16x8xf32>
    %c0_70 = arith.constant 0 : index
    %c0_71 = arith.constant 0 : index
    %c0_72 = arith.constant 0 : index
    %93 = vector.load %arg1[%c0_70, %c0_71, %c0_72] : memref<2x16x8xf32, #tpu.memory_space<vmem>>, vector<2x16x8xf32>
    %94 = arith.addf %92, %93 : vector<2x16x8xf32>
    %c0_73 = arith.constant 0 : index
    %c0_74 = arith.constant 0 : index
    %c0_75 = arith.constant 0 : index
    %95 = vector.load %arg12[%c0_73, %c0_74, %c0_75] : memref<2x16x8xf32, #tpu.memory_space<vmem>>, vector<2x16x8xf32>
    tpu.vector_store %arg12[%c0_73, %c0_74, %c0_75], %94 {strides = array<i32>} : memref<2x16x8xf32, #tpu.memory_space<vmem>>, vector<2x16x8xf32>,
    return
  }
  func.func @transform_0(%arg0: i32) -> (i32, i32, i32) {
    %c0_i32 = arith.constant 0 : i32
    %c0_i32_0 = arith.constant 0 : i32
    %c0_i32_1 = arith.constant 0 : i32
    return %arg0, %c0_i32, %c0_i32_0 : i32, i32, i32
  }
  func.func @transform_1(%arg0: i32) -> (i32, i32) {
    %c0_i32 = arith.constant 0 : i32
    %c0_i32_0 = arith.constant 0 : i32
    %c0_i32_1 = arith.constant 0 : i32
    return %c0_i32, %c0_i32_0 : i32, i32
  }
  func.func @transform_2(%arg0: i32) -> (i32, i32) {
    %c0_i32 = arith.constant 0 : i32
    %c0_i32_0 = arith.constant 0 : i32
    %c0_i32_1 = arith.constant 0 : i32
    return %c0_i32, %c0_i32_0 : i32, i32
  }
  func.func @transform_3(%arg0: i32) -> (i32, i32) {
    %c0_i32 = arith.constant 0 : i32
    %c0_i32_0 = arith.constant 0 : i32
    %c0_i32_1 = arith.constant 0 : i32
    return %c0_i32, %c0_i32_0 : i32, i32
  }
  func.func @transform_4(%arg0: i32) -> (i32, i32) {
    %c0_i32 = arith.constant 0 : i32
    %c0_i32_0 = arith.constant 0 : i32
    %c0_i32_1 = arith.constant 0 : i32
    return %c0_i32, %c0_i32_0 : i32, i32
  }
  func.func @transform_5(%arg0: i32) -> (i32, i32) {
    %c0_i32 = arith.constant 0 : i32
    %c0_i32_0 = arith.constant 0 : i32
    %c0_i32_1 = arith.constant 0 : i32
    return %c0_i32, %c0_i32_0 : i32, i32
  }
  func.func @transform_6(%arg0: i32) -> (i32, i32) {
    %c0_i32 = arith.constant 0 : i32
    %c0_i32_0 = arith.constant 0 : i32
    %c0_i32_1 = arith.constant 0 : i32
    return %c0_i32, %c0_i32_0 : i32, i32
  }
  func.func @transform_7(%arg0: i32) -> (i32, i32) {
    %c0_i32 = arith.constant 0 : i32
    %c0_i32_0 = arith.constant 0 : i32
    %c0_i32_1 = arith.constant 0 : i32
    return %c0_i32, %c0_i32_0 : i32, i32
  }
  func.func @transform_8(%arg0: i32) -> (i32, i32) {
    %c0_i32 = arith.constant 0 : i32
    %c0_i32_0 = arith.constant 0 : i32
    %c0_i32_1 = arith.constant 0 : i32
    return %c0_i32, %c0_i32_0 : i32, i32
  }
  func.func @transform_9(%arg0: i32) -> (i32, i32) {
    %c0_i32 = arith.constant 0 : i32
    %c0_i32_0 = arith.constant 0 : i32
    %c0_i32_1 = arith.constant 0 : i32
    return %c0_i32, %c0_i32_0 : i32, i32
  }
  func.func @transform_10(%arg0: i32) -> (i32, i32) {
    %c0_i32 = arith.constant 0 : i32
    %c0_i32_0 = arith.constant 0 : i32
    %c0_i32_1 = arith.constant 0 : i32
    return %c0_i32, %c0_i32_0 : i32, i32
  }
  func.func @transform_11(%arg0: i32) -> (i32, i32, i32) {
    %c0_i32 = arith.constant 0 : i32
    %c0_i32_0 = arith.constant 0 : i32
    %c0_i32_1 = arith.constant 0 : i32
    return %arg0, %c0_i32, %c0_i32_0 : i32, i32, i32
  }
}

</mosaic_0001>

<bundles_post_ra>
// kernel: tpu_custom_call.1
= control target key start
LH: loop header
LB: loop body
LE: loop exit
PB: predicated region body
PF: predicated region fallthrough
CT: control target
= control target key end

     0   :  { %s1144_s17 = smov 0   ;;  %s1310_s0 = inlined_call_operand.vmem [shape: f32[4,16,8], index: 0, kind: input, shape index: {}]   ;;  %s1311_s1 = inlined_call_operand.vmem [shape: f32[24,8], index: 1, kind: input, shape index: {}]   ;;  %s1312_s2 = inlined_call_operand.vmem [shape: f32[1,8], index: 2, kind: input, shape index: {}]   ;;  %s1313_s3 = inlined_call_operand.vmem [shape: f32[1,8], index: 3, kind: input, shape index: {}]   ;;  %s1314_s4 = inlined_call_operand.vmem [shape: f32[1,8], index: 4, kind: input, shape index: {}]   ;;  %s1315_s5 = inlined_call_operand.vmem [shape: f32[24,8], index: 5, kind: input, shape index: {}]   ;;  %s1316_s6 = inlined_call_operand.vmem [shape: f32[1,8], index: 6, kind: input, shape index: {}]   ;;  %s1317_s7 = inlined_call_operand.vmem [shape: f32[1,8], index: 7, kind: input, shape index: {}]   ;;  %s1318_s8 = inlined_call_operand.vmem [shape: f32[1,8], index: 8, kind: input, shape index: {}]   ;;  %s1319_s9 = inlined_call_operand.vmem [shape: f32[1,8], index: 9, kind: input, shape index: {}]   ;;  %s1320_s10 = inlined_call_operand.vmem [shape: f32[1,8], index: 10, kind: input, shape index: {}]   ;;  %s1321_s11 = inlined_call_operand.vmem [shape: f32[4,16,8], index: 11, kind: output, shape index: {}]  }
   0x1 LB: > { %s969_s18 = sadd.s32 4294967295, %s1079_s17   ;;  %p973_p0 = scmp.ge.s32.totalorder %s1079_s17, 1  ;;  %s1079_s17 = sphi %s1144_s17, %s21_s17  }
   0x2   : > { %p339_p1 = scmp.lt.s32.totalorder %s1079_s17, 3 }
   0x4   : > { %p340_p2 = pnand %p973_p0, %p339_p1 }
   0x5   : > { %s974_s19 = sshll.u32 (!%p340_p2), %s969_s18, 1  ;;  %vm399_vm0 = vcmask (!%p340_p2), 58368   ;;  %v1081_v0 = vmov (!%p340_p2), 0.0   ;;  %vm408_vm1 = vcmask (!%p340_p2), 122944   ;;  %v454_v1 = vld [vmem:[%s1311_s1] sm:$0xff] (!%p340_p2)  ;;  %v455_v2 = vld [vmem:[%s1311_s1 + $0x8] sm:$0xff] (!%p340_p2) }
   0x6   : > { %343 = sbr.rel (%p340_p2) target bundleno = 1355 (0x54b), region = 64  ;;  %p382_p3 = scmp.lt.s32.totalorder (!%p340_p2), %s974_s19, 3  ;;  %400 = vst.msk [vmem:[#allocation2] sm:$0x3] (!%p340_p2), %vm399_vm0, %v1081_v0  ;;  %401 = vst.msk [vmem:[#allocation2 + $0x10] sm:$0x3] (!%p340_p2), %vm399_vm0, %v1081_v0  ;;  %v1038_v3 = vpack.c.bf16 (!%p340_p2), %v455_v2, %v454_v1 }
   0x7   : > { %409 = vst.msk [vmem:[#allocation2] sm:$0x1] (!%p340_p2), %vm408_vm1, %v1081_v0  ;;  %410 = vst.msk [vmem:[#allocation2 + $0x10] sm:$0x1] (!%p340_p2), %vm408_vm1, %v1081_v0  ;;  %vm402_vm2 = vcmask (!%p340_p2), 64512   ;;  %vm404_vm3 = vcmask (!%p340_p2), 62464  }
   0x8   : > { %1039 = vmatprep.subr.bf16.mxu0 (!%p340_p2), %v1038_v3  ;;  %v456_v4 = vld [vmem:[%s1311_s1 + $0x10] sm:$0xff] (!%p340_p2)  ;;  %s1082_s30 = smov (!%p340_p2), 8   ;;  %s1083_s12 = smov (!%p340_p2), 16   ;;  %vm427_vm4 = vcmask (!%p340_p2), 130112   ;;  %vm445_vm5 = vcmask (!%p340_p2), 195712   ;;  %vm429_vm6 = vcmask (!%p340_p2), 129088  }
   0x9   : > { %1041 = vmatpush3.bf16.msra.mxu0 (!%p340_p2), %v1038_v3  ;;  %vm464_vm7 = vcmask (!%p340_p2), 195584   ;;  %vm659_vm8 = vcmask (!%p340_p2), 123968   ;;  %vm652_vm9 = vcmask (!%p340_p2), 60416   ;;  %v980_v21 = vld [vmem:[%s1312_s2] ss:$0 sm:$0xff] (!%p340_p2)  ;;  %vm679_vm10 = vcmask (!%p340_p2), 128064  }
   0xa   : > { %1018 = vmatprep.subr.mxu0 (!%p340_p2), %v456_v4  ;;  %v985_v2 = vld [vmem:[%s1313_s3] ss:$0 sm:$0xff] (!%p340_p2) }
   0xd   : > { %s1323_s19 = smov (!%p382_p3, %s974_s19), 3  ;;  %1019 = vmatpush3.msra.mxu0 %v456_v4 }
   0xe   : > { %s998_s24 = sshll.u32 %s1323_s19, 4 }
   0xf   : > { %s386_s29 = scalar_lea.vmem %s1310_s0, %s998_s24  ;;  %s393_s23 = scalar_lea.vmem %s1321_s11, %s998_s24 }
  0x10   : > { %v1173_v5 = vld [vmem:[%s386_s29] sm:$0xff]  ;;  %v1175_v6 = vld [vmem:[%s386_s29 + $0x8] sm:$0xff]  ;;  %v1177_v7 = vld [vmem:[%s386_s29 + $0x10] sm:$0xff] }
  0x11   : > { %415 = vrot.lane.b32.xlu0 %v1173_v5, %s1082_s30  ;;  %403 = vst.msk [vmem:[#allocation2 + $0x2] sm:$0xff] %vm402_vm2, %v1173_v5  ;;  %433 = vrot.lane.b32.xlu1 %v1173_v5, %s1083_s12  ;;  %406 = vst.msk [vmem:[#allocation2 + $0x12] sm:$0xff] %vm402_vm2, %v1177_v7  ;;  %v1189_v8 = vld [vmem:[%s386_s29 + $0x18] sm:$0xff] }
  0x12   : > { %405 = vst.msk [vmem:[#allocation2 + $0xa] sm:$0x3f] %vm404_vm3, %v1175_v6  ;;  %407 = vst.msk [vmem:[#allocation2 + $0x1a] sm:$0x3f] %vm404_vm3, %v1189_v8 }
  0x15   : > { %417 = vrot.lane.b32.xlu0 %v1175_v6, %s1082_s30  ;;  %435 = vrot.lane.b32.xlu1 %v1175_v6, %s1083_s12 }
  0x19   : > { %419 = vrot.lane.b32.xlu0 %v1177_v7, %s1082_s30  ;;  %421 = vrot.lane.b32.xlu1 %v1189_v8, %s1082_s30 }
  0x1d   : > { %437 = vrot.lane.b32.xlu0 %v1177_v7, %s1083_s12  ;;  %439 = vrot.lane.b32.xlu1 %v1189_v8, %s1083_s12 }
  0x83   : > { %v416_v9 = vpop.permute.xlu0 %415  ;;  %v434_v10 = vpop.permute.xlu1 %433 }
  0x84   : > { %428 = vst.msk [vmem:[#allocation2 + $0x1] sm:$0xff] %vm427_vm4, %v416_v9 }
  0x85   : > { %446 = vst.msk [vmem:[#allocation2] sm:$0xff] %vm445_vm5, %v434_v10  ;;  %v986_v10 = vld [vmem:[%s1314_s4] ss:$0 sm:$0xff] }
  0x87   : > { %v418_v11 = vpop.permute.xlu0 %417  ;;  %v436_v12 = vpop.permute.xlu1 %435 }
  0x88   : > { %430 = vst.msk [vmem:[#allocation2 + $0x9] sm:$0x7f] %vm429_vm6, %v418_v11 }
  0x89   : > { %447 = vst.msk [vmem:[#allocation2 + $0x8] sm:$0xff] %vm445_vm5, %v436_v12 }
  0x8b   : > { %v420_v13 = vpop.permute.xlu0 %419  ;;  %v422_v14 = vpop.permute.xlu1 %421 }
  0x8c   : > { %v450_v15 = vld [vmem:[#allocation2] sm:$0xff]  ;;  %431 = vst.msk [vmem:[#allocation2 + $0x11] sm:$0xff] %vm427_vm4, %v420_v13 }
  0x8d   : > { %432 = vst.msk [vmem:[#allocation2 + $0x19] sm:$0x7f] %vm429_vm6, %v422_v14  ;;  %1020 = vmatprep.mubr.msk.f32.mxu0 %vm464_vm7, %v450_v15  ;;  %v987_v15 = vld [vmem:[%s1319_s9] ss:$0 sm:$0xff] }
  0x8e   : > { %653 = vst.msk [vmem:[#allocation2] sm:$0xf] %vm652_vm9, %v1081_v0 }
  0x8f   : > { %660 = vst.msk [vmem:[#allocation2] sm:$0x3] %vm659_vm8, %v1081_v0  ;;  %v438_v16 = vpop.permute.xlu0 %437  ;;  %v440_v17 = vpop.permute.xlu1 %439 }
  0x90   : > { %448 = vst.msk [vmem:[#allocation2 + $0x10] sm:$0xff] %vm445_vm5, %v438_v16  ;;  %449 = vst.msk [vmem:[#allocation2 + $0x18] sm:$0xff] %vm445_vm5, %v440_v17  ;;  %v451_v18 = vld [vmem:[#allocation2 + $0x8] sm:$0xff]  ;;  %v703_v17 = vld [vmem:[%s1315_s5] sm:$0xff] }
  0x91   : > { %1021 = vmatmul.mubr.msk.f32.vlgmr.msra.gmra.mrb[0].mxu0 %vm464_vm7, %v451_v18  ;;  %v704_v18 = vld [vmem:[%s1315_s5 + $0x8] sm:$0xff] }
  0x97   : > { %v452_v19 = vld [vmem:[#allocation2 + $0x10] sm:$0xff]  ;;  %v453_v20 = vld [vmem:[#allocation2 + $0x18] sm:$0xff] }
  0x98   : > { %654 = vst.msk [vmem:[#allocation2 + $0x10] sm:$0xf] %vm652_vm9, %v1081_v0  ;;  %1023 = vmatprep.mubr.msk.f32.mxu0 %vm464_vm7, %v452_v19 }
  0x99   : > { %661 = vst.msk [vmem:[#allocation2 + $0x10] sm:$0x3] %vm659_vm8, %v1081_v0  ;;  %1024 = vmatmul.mubr.msk.f32.gmra.mrb[2].mxu0 %vm464_vm7, %v453_v20  ;;  %v1042_v20 = vpack.c.bf16 %v704_v18, %v703_v17 }
  0x9b   : > { %1043 = vmatprep.subr.bf16.mxu1 %v1042_v20 }
  0x9c   : > { %1045 = vmatpush3.bf16.msra.mxu1 %v1042_v20 }
 0x164   : > { %v1022_v22 = vpop.f32.mrb[0].mxu0 }
 0x165   : > { %v549_v23 = vadd.f32 %v1022_v22, %v980_v21  ;;  %v543_v24 = vpop.f32.mrb[1].mxu0 }
 0x166   : > { %v544_v25 = vadd.f32 %v980_v21, %v543_v24 }
 0x167   : > { %v565_v26 = vsel %vm402_vm2, %v549_v23, 0.0 }
 0x168   : > { %566 = vadd.xlane.f32.xlu1 %v565_v26  ;;  %v562_v27 = vsel %vm402_vm2, %v544_v25, 0.0  ;;  %v705_v26 = vld [vmem:[%s1315_s5 + $0x10] sm:$0xff] }
 0x169   : > { %563 = vadd.xlane.f32.xlu0 %v562_v27  ;;  %1030 = vmatprep.subr.mxu1 %v705_v26 }
 0x16a   : > { %1031 = vmatpush3.msra.mxu1 %v705_v26 }
 0x16c   : > { %v1025_v28 = vpop.f32.mrb[2].mxu0 }
 0x16d   : > { %v553_v29 = vpop.f32.mrb[3].mxu0  ;;  %v559_v31 = vadd.f32 %v1025_v28, %v980_v21 }
 0x16e   : > { %v554_v30 = vadd.f32 %v980_v21, %v553_v29 }
 0x16f   : > { %v571_v33 = vsel %vm402_vm2, %v559_v31, 0.0 }
 0x170   : > { %v568_v32 = vsel %vm402_vm2, %v554_v30, 0.0 }
 0x171   : > { %569 = vadd.xlane.f32.xlu0 %v568_v32 }
 0x175   : > { %572 = vadd.xlane.f32.xlu0 %v571_v33 }
 0x1f5   : > { %v567_v34 = vpop.xlane.xlu1 %566 }
 0x1f6   : > { %v576_v35 = vmul.f32 0.125, %v567_v34  ;;  %v564_v36 = vpop.xlane.xlu0 %563 }
 0x1f7   : > { %v575_v37 = vmul.f32 0.125, %v564_v36 }
 0x1f8   : > { %v580_v38 = vsub.f32 %v549_v23, %v576_v35 }
 0x1f9   : > { %v579_v39 = vsub.f32 %v544_v25, %v575_v37 }
 0x1fa   : > { %v584_v40 = vmul.f32 %v580_v38, %v580_v38 }
 0x1fb   : > { %v583_v41 = vmul.f32 %v579_v39, %v579_v39 }
 0x1fc   : > { %v590_v42 = vsel %vm402_vm2, %v584_v40, 0.0 }
 0x1fd   : > { %591 = vadd.xlane.f32.xlu0 %v590_v42  ;;  %v587_v43 = vsel %vm402_vm2, %v583_v41, 0.0 }
 0x1fe   : > { %588 = vadd.xlane.f32.xlu1 %v587_v43  ;;  %v570_v44 = vpop.xlane.xlu0 %569 }
 0x1ff   : > { %v577_v45 = vmul.f32 0.125, %v570_v44 }
 0x201   : > { %v581_v46 = vsub.f32 %v554_v30, %v577_v45 }
 0x202   : > { %v573_v47 = vpop.xlane.xlu0 %572 }
 0x203   : > { %v578_v48 = vmul.f32 0.125, %v573_v47  ;;  %v585_v49 = vmul.f32 %v581_v46, %v581_v46 }
 0x205   : > { %v582_v50 = vsub.f32 %v559_v31, %v578_v48  ;;  %v593_v51 = vsel %vm402_vm2, %v585_v49, 0.0  ;;  %v988_v49 = vld [vmem:[%s1316_s6] ss:$0 sm:$0xff] }
 0x206   : > { %594 = vadd.xlane.f32.xlu1 %v593_v51 }
 0x207   : > { %v586_v52 = vmul.f32 %v582_v50, %v582_v50 }
 0x209   : > { %v596_v53 = vsel %vm402_vm2, %v586_v52, 0.0 }
 0x20a   : > { %597 = vadd.xlane.f32.xlu0 %v596_v53 }
 0x28a   : > { %v592_v54 = vpop.xlane.xlu0 %591 }
 0x28b   : > { %v600_v55 = vmul.f32 0.125, %v592_v54  ;;  %v589_v56 = vpop.xlane.xlu1 %588 }
 0x28c   : > { %v599_v57 = vmul.f32 0.125, %v589_v56 }
 0x28d   : > { %v604_v58 = vadd.f32 1e-08, %v600_v55 }
 0x28e   : > { %v603_v59 = vadd.f32 1e-08, %v599_v57 }
 0x28f   : > { %1057 = vrsqrt.f32 %v604_v58 }
 0x290   : > { %1059 = vrsqrt.f32 %v603_v59 }
 0x293   : > { %v595_v60 = vpop.xlane.xlu1 %594 }
 0x294   : > { %v601_v61 = vmul.f32 0.125, %v595_v60 }
 0x296   : > { %v605_v62 = vadd.f32 1e-08, %v601_v61 }
 0x297   : > { %v598_v63 = vpop.xlane.xlu0 %597 }
 0x298   : > { %1061 = vrsqrt.f32 %v605_v62  ;;  %v602_v0 = vmul.f32 0.125, %v598_v63 }
 0x299   : > { %v1058_v1 = vpop.eup %1057 }
 0x29a   : > { %v1060_v3 = vpop.eup %1059  ;;  %v606_v4 = vadd.f32 1e-08, %v602_v0  ;;  %v612_v9 = vmul.f32 %v1058_v1, %v580_v38 }
 0x29b   : > { %v611_v11 = vmul.f32 %v1060_v3, %v579_v39 }
 0x29c   : > { %1063 = vrsqrt.f32 %v606_v4  ;;  %v623_v12 = vmul.f32 %v985_v2, %v612_v9 }
 0x29d   : > { %v622_v13 = vmul.f32 %v985_v2, %v611_v11 }
 0x29e   : > { %v634_v14 = vadd.f32 %v986_v10, %v623_v12 }
 0x29f   : > { %v633_v16 = vadd.f32 %v986_v10, %v622_v13 }
 0x2a0   : > { %v638_v19 = vmax.f32 %v634_v14, 0.0 }
 0x2a1   : > { %v637_v21 = vmax.f32 %v633_v16, 0.0 }
 0x2a2   : > { %v1062_v22 = vpop.eup %1061  ;;  %v649_v23 = vmul.f32 %v987_v15, %v638_v19 }
 0x2a3   : > { %v648_v24 = vmul.f32 %v987_v15, %v637_v21  ;;  %v613_v25 = vmul.f32 %v1062_v22, %v581_v46 }
 0x2a4   : > { %685 = vrot.lane.b32.xlu1 %v649_v23, %s1083_s12  ;;  %656 = vst.msk [vmem:[#allocation2 + $0xc] sm:$0xf] %vm652_vm9, %v649_v23  ;;  %668 = vrot.lane.b32.xlu0 %v649_v23, %s1082_s30 }
 0x2a5   : > { %655 = vst.msk [vmem:[#allocation2 + $0x4] sm:$0xff] %vm402_vm2, %v648_v24  ;;  %v624_v27 = vmul.f32 %v985_v2, %v613_v25 }
 0x2a6   : > { %v1064_v28 = vpop.eup %1063 }
 0x2a7   : > { %v635_v29 = vadd.f32 %v986_v10, %v624_v27  ;;  %v614_v30 = vmul.f32 %v1064_v28, %v582_v50 }
 0x2a8   : > { %666 = vrot.lane.b32.xlu1 %v648_v24, %s1082_s30 }
 0x2a9   : > { %v639_v31 = vmax.f32 %v635_v29, 0.0  ;;  %v625_v32 = vmul.f32 %v985_v2, %v614_v30 }
 0x2ab   : > { %v650_v33 = vmul.f32 %v987_v15, %v639_v31  ;;  %v636_v34 = vadd.f32 %v986_v10, %v625_v32 }
 0x2ac   : > { %683 = vrot.lane.b32.xlu1 %v648_v24, %s1083_s12 }
 0x2ad   : > { %670 = vrot.lane.b32.xlu0 %v650_v33, %s1082_s30  ;;  %657 = vst.msk [vmem:[#allocation2 + $0x14] sm:$0xff] %vm402_vm2, %v650_v33  ;;  %v640_v35 = vmax.f32 %v636_v34, 0.0  ;;  %v993_v34 = vld [vmem:[%s1317_s7] ss:$0 sm:$0xff] }
 0x2af   : > { %v651_v36 = vmul.f32 %v987_v15, %v640_v35 }
 0x2b1   : > { %687 = vrot.lane.b32.xlu0 %v650_v33, %s1083_s12  ;;  %672 = vrot.lane.b32.xlu1 %v651_v36, %s1082_s30  ;;  %658 = vst.msk [vmem:[#allocation2 + $0x1c] sm:$0xf] %vm652_vm9, %v651_v36 }
 0x2b5   : > { %689 = vrot.lane.b32.xlu1 %v651_v36, %s1083_s12 }
 0x316   : > { %v686_v37 = vpop.permute.xlu1 %685  ;;  %v669_v38 = vpop.permute.xlu0 %668 }
 0x317   : > { %680 = vst.msk [vmem:[#allocation2 + $0xa] sm:$0x3f] %vm679_vm10, %v669_v38  ;;  %v994_v38 = vld [vmem:[%s1318_s8] ss:$0 sm:$0xff] }
 0x31a   : > { %v667_v39 = vpop.permute.xlu1 %666 }
 0x31b   : > { %678 = vst.msk [vmem:[#allocation2 + $0x2] sm:$0xff] %vm427_vm4, %v667_v39 }
 0x31c   : > { %696 = vst.msk [vmem:[#allocation2 + $0x8] sm:$0xff] %vm445_vm5, %v686_v37 }
 0x31e   : > { %v684_v40 = vpop.permute.xlu1 %683 }
 0x31f   : > { %695 = vst.msk [vmem:[#allocation2] sm:$0xff] %vm445_vm5, %v684_v40  ;;  %v671_v41 = vpop.permute.xlu0 %670 }
 0x320   : > { %681 = vst.msk [vmem:[#allocation2 + $0x12] sm:$0xff] %vm427_vm4, %v671_v41 }
 0x323   : > { %v673_v42 = vpop.permute.xlu1 %672  ;;  %v688_v43 = vpop.permute.xlu0 %687  ;;  %v700_v46 = vld [vmem:[#allocation2 + $0x8] sm:$0xff] }
 0x324   : > { %682 = vst.msk [vmem:[#allocation2 + $0x1a] sm:$0x3f] %vm679_vm10, %v673_v42 }
 0x325   : > { %697 = vst.msk [vmem:[#allocation2 + $0x10] sm:$0xff] %vm445_vm5, %v688_v43  ;;  %v995_v43 = vld [vmem:[%s1320_s10] ss:$0 sm:$0xff] }
 0x326   : > { %v699_v44 = vld [vmem:[#allocation2] sm:$0xff] }
 0x327   : > { %1032 = vmatprep.mubr.msk.f32.mxu1 %vm464_vm7, %v699_v44  ;;  %v690_v45 = vpop.permute.xlu1 %689 }
 0x328   : > { %698 = vst.msk [vmem:[#allocation2 + $0x18] sm:$0xff] %vm445_vm5, %v690_v45  ;;  %1033 = vmatmul.mubr.msk.f32.vlgmr.msra.gmra.mrb[0].mxu1 %vm464_vm7, %v700_v46 }
 0x32c   : > { %v701_v47 = vld [vmem:[#allocation2 + $0x10] sm:$0xff] }
 0x32d   : > { %1035 = vmatprep.mubr.msk.f32.mxu1 %vm464_vm7, %v701_v47 }
 0x32f   : > { %v702_v48 = vld [vmem:[#allocation2 + $0x18] sm:$0xff] }
 0x330   : > { %1036 = vmatmul.mubr.msk.f32.gmra.mrb[2].mxu1 %vm464_vm7, %v702_v48 }
 0x3fb   : > { %v1034_v50 = vpop.f32.mrb[0].mxu1 }
 0x3fc   : > { %v797_v51 = vadd.f32 %v1034_v50, %v988_v49  ;;  %v791_v52 = vpop.f32.mrb[1].mxu1 }
 0x3fd   : > { %v792_v53 = vadd.f32 %v988_v49, %v791_v52 }
 0x3fe   : > { %v813_v54 = vsel %vm402_vm2, %v797_v51, 0.0 }
 0x3ff   : > { %814 = vadd.xlane.f32.xlu1 %v813_v54  ;;  %v810_v55 = vsel %vm402_vm2, %v792_v53, 0.0 }
 0x400   : > { %811 = vadd.xlane.f32.xlu0 %v810_v55 }
 0x403   : > { %v1037_v56 = vpop.f32.mrb[2].mxu1 }
 0x404   : > { %v801_v57 = vpop.f32.mrb[3].mxu1  ;;  %v807_v59 = vadd.f32 %v1037_v56, %v988_v49 }
 0x405   : > { %v802_v58 = vadd.f32 %v988_v49, %v801_v57 }
 0x406   : > { %v819_v61 = vsel %vm402_vm2, %v807_v59, 0.0 }
 0x407   : > { %v816_v60 = vsel %vm402_vm2, %v802_v58, 0.0 }
 0x408   : > { %817 = vadd.xlane.f32.xlu0 %v816_v60 }
 0x40c   : > { %820 = vadd.xlane.f32.xlu0 %v819_v61 }
 0x48c   : > { %v815_v62 = vpop.xlane.xlu1 %814 }
 0x48d   : > { %v823_v63 = vmul.f32 0.125, %v815_v62  ;;  %v812_v0 = vpop.xlane.xlu0 %811 }
 0x48e   : > { %v822_v1 = vmul.f32 0.125, %v812_v0 }
 0x48f   : > { %v827_v2 = vsub.f32 %v797_v51, %v823_v63 }
 0x490   : > { %v826_v3 = vsub.f32 %v792_v53, %v822_v1 }
 0x491   : > { %v831_v4 = vmul.f32 %v827_v2, %v827_v2 }
 0x492   : > { %v830_v9 = vmul.f32 %v826_v3, %v826_v3 }
 0x493   : > { %v837_v10 = vsel %vm402_vm2, %v831_v4, 0.0 }
 0x494   : > { %838 = vadd.xlane.f32.xlu0 %v837_v10  ;;  %v834_v11 = vsel %vm402_vm2, %v830_v9, 0.0 }
 0x495   : > { %835 = vadd.xlane.f32.xlu1 %v834_v11  ;;  %v818_v12 = vpop.xlane.xlu0 %817 }
 0x496   : > { %v824_v13 = vmul.f32 0.125, %v818_v12 }
 0x498   : > { %v828_v14 = vsub.f32 %v802_v58, %v824_v13 }
 0x499   : > { %v821_v15 = vpop.xlane.xlu0 %820 }
 0x49a   : > { %v825_v16 = vmul.f32 0.125, %v821_v15  ;;  %v832_v17 = vmul.f32 %v828_v14, %v828_v14 }
 0x49c   : > { %v829_v18 = vsub.f32 %v807_v59, %v825_v16  ;;  %v840_v19 = vsel %vm402_vm2, %v832_v17, 0.0 }
 0x49d   : > { %841 = vadd.xlane.f32.xlu1 %v840_v19 }
 0x49e   : > { %v833_v20 = vmul.f32 %v829_v18, %v829_v18 }
 0x4a0   : > { %v843_v21 = vsel %vm402_vm2, %v833_v20, 0.0 }
 0x4a1   : > { %844 = vadd.xlane.f32.xlu0 %v843_v21 }
 0x521   : > { %v839_v22 = vpop.xlane.xlu0 %838 }
 0x522   : > { %v847_v23 = vmul.f32 0.125, %v839_v22  ;;  %v836_v24 = vpop.xlane.xlu1 %835 }
 0x523   : > { %v846_v25 = vmul.f32 0.125, %v836_v24 }
 0x524   : > { %v851_v26 = vadd.f32 1e-08, %v847_v23 }
 0x525   : > { %v850_v27 = vadd.f32 1e-08, %v846_v25 }
 0x526   : > { %1065 = vrsqrt.f32 %v851_v26 }
 0x527   : > { %1067 = vrsqrt.f32 %v850_v27 }
 0x52a   : > { %v842_v28 = vpop.xlane.xlu1 %841 }
 0x52b   : > { %v848_v29 = vmul.f32 0.125, %v842_v28 }
 0x52d   : > { %v852_v30 = vadd.f32 1e-08, %v848_v29 }
 0x52e   : > { %v845_v31 = vpop.xlane.xlu0 %844 }
 0x52f   : > { %1069 = vrsqrt.f32 %v852_v30  ;;  %v849_v32 = vmul.f32 0.125, %v845_v31 }
 0x530   : > { %v1066_v33 = vpop.eup %1065 }
 0x531   : > { %v1068_v35 = vpop.eup %1067  ;;  %v859_v36 = vmul.f32 %v1066_v33, %v827_v2  ;;  %v853_v37 = vadd.f32 1e-08, %v849_v32 }
 0x532   : > { %v858_v39 = vmul.f32 %v1068_v35, %v826_v3 }
 0x533   : > { %v870_v40 = vmul.f32 %v993_v34, %v859_v36  ;;  %1071 = vrsqrt.f32 %v853_v37 }
 0x534   : > { %v869_v41 = vmul.f32 %v993_v34, %v858_v39 }
 0x535   : > { %v881_v42 = vadd.f32 %v994_v38, %v870_v40 }
 0x536   : > { %v880_v44 = vadd.f32 %v994_v38, %v869_v41 }
 0x537   : > { %v885_v45 = vmax.f32 %v881_v42, 0.0 }
 0x538   : > { %v884_v46 = vmax.f32 %v880_v44, 0.0 }
 0x539   : > { %v1070_v47 = vpop.eup %1069  ;;  %v896_v48 = vmul.f32 %v995_v43, %v885_v45 }
 0x53a   : > { %v895_v49 = vmul.f32 %v995_v43, %v884_v46  ;;  %v860_v50 = vmul.f32 %v1070_v47, %v828_v14 }
 0x53b   : > { %v904_v51 = vadd.f32 %v896_v48, %v1175_v6 }
 0x53c   : > { %v903_v52 = vadd.f32 %v895_v49, %v1173_v5  ;;  %v871_v53 = vmul.f32 %v993_v34, %v860_v50 }
 0x53d   : > { %v1072_v54 = vpop.eup %1071  ;;  %908 = vst.msk [vmem:[%s393_s23 + $0x8] sm:$0xff] %vm402_vm2, %v904_v51 }
 0x53e   : > { %907 = vst.msk [vmem:[%s393_s23] sm:$0xff] %vm402_vm2, %v903_v52  ;;  %v882_v55 = vadd.f32 %v994_v38, %v871_v53  ;;  %v861_v56 = vmul.f32 %v1072_v54, %v829_v18 }
 0x540   : > { %v886_v57 = vmax.f32 %v882_v55, 0.0  ;;  %v872_v58 = vmul.f32 %v993_v34, %v861_v56 }
 0x542   : > { %v897_v59 = vmul.f32 %v995_v43, %v886_v57  ;;  %v883_v60 = vadd.f32 %v994_v38, %v872_v58 }
 0x544   : > { %v905_v61 = vadd.f32 %v897_v59, %v1177_v7  ;;  %v887_v62 = vmax.f32 %v883_v60, 0.0 }
 0x546   : > { %909 = vst.msk [vmem:[%s393_s23 + $0x10] sm:$0xff] %vm402_vm2, %v905_v61  ;;  %v898_v6 = vmul.f32 %v995_v43, %v887_v62 }
 0x548   : > { %v906_v5 = vadd.f32 %v898_v6, %v1189_v8 }
 0x54a   : > { %910 = vst.msk [vmem:[%s393_s23 + $0x18] sm:$0xff] %vm402_vm2, %v906_v5 }
 0x54b PF: > { %s21_s17 = sadd.s32 1, %s1079_s17  }
 0x54c   : > { %p18_p4 = scmp.ge.s32.totalorder %s21_s17, 4  }
 0x54e   :  { %20 = sbr.rel (!%p18_p4) target bundleno = 1 (0x1), region = 94 }

</bundles_post_ra>
